<compile_context>
chip_gen: v7x
topology: tpu7x:2x2x1
jax: 0.10.0
libtpu: 0.0.40
codegen_flags: <defaults>
</compile_context>

<pallas_src>
import functools

import jax
import jax.numpy as jnp
from jax.experimental import pallas as pl
from jax.experimental.pallas import tpu as pltpu

N_FEATURE = 4
N_HIDDEN = 20
N_OUTPUT = 3


def bpnet_kernel(x_ref, w1_ref, b1_ref, w2_ref, b2_ref, out_ref):
    # x_ref:  [F, TB]   (batch on lanes -> lane-dense loads/stores)
    # w1_ref: [H, F], b1_ref: [H, 1]
    # w2_ref: [O, H], b2_ref: [O, 1]
    # out_ref:[O, TB]
    x = x_ref[...]

    # Hidden layer: (W1^T @ x) + b1, ReLU   -> [H, TB]
    h = jnp.dot(w1_ref[...], x, preferred_element_type=jnp.float32) + b1_ref[...]
    h = jnp.maximum(h, 0.0)

    # Output layer: (W2^T @ h) + b2         -> [O, TB]
    logits = jnp.dot(w2_ref[...], h, preferred_element_type=jnp.float32) + b2_ref[...]

    # Softmax over the class axis (axis=0 here == dim=1 of the original [B, O] layout).
    # Exact divide so each column sums to 1 to f32 precision.
    m = jnp.max(logits, axis=0, keepdims=True)
    e = jnp.exp(logits - m)
    denom = jnp.sum(e, axis=0, keepdims=True)
    out_ref[...] = (e / denom).astype(out_ref.dtype)


def _round_up(n, m):
    return ((n + m - 1) // m) * m


def _choose_tiling(batch, desired_tb):
    """Pad batch to a multiple of 128 and pick a 128-aligned tile.

    Waste is at most (steps-1)*128 columns.  Force >=2 grid steps when possible so the
    "parallel" batch axis can use both TensorCores on v7x.
    """
    bp128 = _round_up(max(batch, 1), 128)
    min_steps = 2 if bp128 >= 256 else 1
    steps = max(pl.cdiv(bp128, desired_tb), min_steps)
    tb = _round_up(pl.cdiv(bp128, steps), 128)
    steps = pl.cdiv(bp128, tb)
    return steps * tb, tb, steps


@functools.partial(jax.jit, static_argnames=("tb",))
def bpnet_forward(x, w1, b1, w2, b2, *, tb=32768):
    """x: [B, F] f32; w1: [F, H]; b1: [H]; w2: [H, O]; b2: [O] -> [B, O] softmax probs."""
    B = x.shape[0]
    Bp, tb, steps = _choose_tiling(B, tb)

    # Batch-on-lanes layout, zero-padded tail (padding columns are sliced off below).
    # Under jit + allow_input_fusion, XLA may fuse this transpose/pad into the input DMA.
    x_t = jnp.pad(x.T.astype(jnp.float32), ((0, 0), (0, Bp - B)))   # [F, Bp]
    w1t = w1.T.astype(jnp.float32)                                  # [H, F]
    b1c = b1.reshape(N_HIDDEN, 1).astype(jnp.float32)               # [H, 1]
    w2t = w2.T.astype(jnp.float32)                                  # [O, H]
    b2c = b2.reshape(N_OUTPUT, 1).astype(jnp.float32)               # [O, 1]

    out_t = pl.pallas_call(
        bpnet_kernel,
        out_shape=jax.ShapeDtypeStruct((N_OUTPUT, Bp), jnp.float32),
        grid=(steps,),
        in_specs=[
            pl.BlockSpec((N_FEATURE, tb), lambda i: (0, i)),        # x block, pipelined
            pl.BlockSpec((N_HIDDEN, N_FEATURE), lambda i: (0, 0)),  # W1^T, VMEM-resident
            pl.BlockSpec((N_HIDDEN, 1), lambda i: (0, 0)),          # b1
            pl.BlockSpec((N_OUTPUT, N_HIDDEN), lambda i: (0, 0)),   # W2^T
            pl.BlockSpec((N_OUTPUT, 1), lambda i: (0, 0)),          # b2
        ],
        out_specs=pl.BlockSpec((N_OUTPUT, tb), lambda i: (0, i)),   # lane-dense output
        compiler_params=pltpu.CompilerParams(
            dimension_semantics=("parallel",),                  # shard batch steps on v7x
            allow_input_fusion=[True, True, True, True, True],  # fuse transpose/pad/cast
        ),
    )(x_t, w1t, b1c, w2t, b2c)

    return out_t[:, :B].T  # back to [B, O]


def init_params(key):
    # Deterministic init mimicking torch.nn.Linear's U(-1/sqrt(fan_in), 1/sqrt(fan_in)).
    k1, k2, k3, k4 = jax.random.split(key, 4)
    bound1 = 1.0 / jnp.sqrt(jnp.float32(N_FEATURE))
    bound2 = 1.0 / jnp.sqrt(jnp.float32(N_HIDDEN))
    w1 = jax.random.uniform(k1, (N_FEATURE, N_HIDDEN), jnp.float32, -bound1, bound1)
    b1 = jax.random.uniform(k2, (N_HIDDEN,), jnp.float32, -bound1, bound1)
    w2 = jax.random.uniform(k3, (N_HIDDEN, N_OUTPUT), jnp.float32, -bound2, bound2)
    b2 = jax.random.uniform(k4, (N_OUTPUT,), jnp.float32, -bound2, bound2)
    return w1, b1, w2, b2


def reference_forward(x, w1, b1, w2, b2):
    h = jnp.maximum(x @ w1 + b1[None, :], 0.0)
    logits = h @ w2 + b2[None, :]
    return jax.nn.softmax(logits, axis=1)


if __name__ == "__main__":
    key = jax.random.PRNGKey(0)
    kx, kp = jax.random.split(key)
    batch = 8
    x = jax.random.normal(kx, (batch, N_FEATURE), jnp.float32)
    w1, b1, w2, b2 = init_params(kp)

    out = bpnet_forward(x, w1, b1, w2, b2)
    out = jax.block_until_ready(out)

    ref = reference_forward(x, w1, b1, w2, b2)
    assert out.shape == (batch, N_OUTPUT)
    assert jnp.allclose(out, ref, atol=1e-3, rtol=1e-3)
    # Exact softmax divide -> rows sum to 1 to f32 precision.
    assert jnp.allclose(jnp.sum(out, axis=1), jnp.ones((batch,)), atol=1e-3)

    print("KERNEL_OK")
</pallas_src>

<mosaic_0001>
module attributes {stable_mosaic.version = 11 : i64} {
  func.func @bpnet_kernel(%arg0: i32, %arg1: memref<4x128xf32, #tpu.memory_space<vmem>>, %arg2: memref<20x4xf32, #tpu.memory_space<vmem>>, %arg3: memref<20x1xf32, #tpu.memory_space<vmem>>, %arg4: memref<3x20xf32, #tpu.memory_space<vmem>>, %arg5: memref<3x1xf32, #tpu.memory_space<vmem>>, %arg6: memref<3x128xf32, #tpu.memory_space<vmem>>) attributes {dimension_semantics = [#tpu.dimension_semantics<parallel>], iteration_bounds = array<i64: 1>, scalar_prefetch = 0 : i64, scratch_operands = 0 : i64, tpu.core_type = #tpu.core_type<tc>, window_params = [{transform_indices = @transform_0, window_bounds = array<i64: 4, 128>}, {pipeline_mode = #tpu.pipeline_mode<synchronous>, transform_indices = @transform_1, window_bounds = array<i64: 20, 4>}, {pipeline_mode = #tpu.pipeline_mode<synchronous>, transform_indices = @transform_2, window_bounds = array<i64: 20, 1>}, {pipeline_mode = #tpu.pipeline_mode<synchronous>, transform_indices = @transform_3, window_bounds = array<i64: 3, 20>}, {pipeline_mode = #tpu.pipeline_mode<synchronous>, transform_indices = @transform_4, window_bounds = array<i64: 3, 1>}, {transform_indices = @transform_5, window_bounds = array<i64: 3, 128>}]} {
    %c0 = arith.constant 0 : index
    %c0_0 = arith.constant 0 : index
    %0 = vector.load %arg1[%c0, %c0_0] : memref<4x128xf32, #tpu.memory_space<vmem>>, vector<4x128xf32>
    %c0_1 = arith.constant 0 : index
    %c0_2 = arith.constant 0 : index
    %1 = vector.load %arg2[%c0_1, %c0_2] : memref<20x4xf32, #tpu.memory_space<vmem>>, vector<20x4xf32>
    %cst = arith.constant dense<0.000000e+00> : vector<20x128xf32>
    %2 = tpu.matmul %1, %0, %cst {dimension_numbers = #tpu.dot_dimension_numbers<[1], [0], [0], [1], [0, 0, 1, 1], [], []>} : vector<20x4xf32>, vector<4x128xf32>, vector<20x128xf32> -> vector<20x128xf32>
    %c0_3 = arith.constant 0 : index
    %c0_4 = arith.constant 0 : index
    %3 = vector.load %arg3[%c0_3, %c0_4] : memref<20x1xf32, #tpu.memory_space<vmem>>, vector<20x1xf32>
    %4 = vector.broadcast %3 : vector<20x1xf32> to vector<20x128xf32>
    %5 = arith.addf %2, %4 : vector<20x128xf32>
    %cst_5 = arith.constant 0.000000e+00 : f32
    %6 = vector.broadcast %cst_5 : f32 to vector<20x128xf32>
    %7 = arith.maximumf %5, %6 : vector<20x128xf32>
    %c0_6 = arith.constant 0 : index
    %c0_7 = arith.constant 0 : index
    %8 = vector.load %arg4[%c0_6, %c0_7] : memref<3x20xf32, #tpu.memory_space<vmem>>, vector<3x20xf32>
    %cst_8 = arith.constant dense<0.000000e+00> : vector<3x128xf32>
    %9 = tpu.matmul %8, %7, %cst_8 {dimension_numbers = #tpu.dot_dimension_numbers<[1], [0], [0], [1], [0, 0, 1, 1], [], []>} : vector<3x20xf32>, vector<20x128xf32>, vector<3x128xf32> -> vector<3x128xf32>
    %c0_9 = arith.constant 0 : index
    %c0_10 = arith.constant 0 : index
    %10 = vector.load %arg5[%c0_9, %c0_10] : memref<3x1xf32, #tpu.memory_space<vmem>>, vector<3x1xf32>
    %11 = vector.broadcast %10 : vector<3x1xf32> to vector<3x128xf32>
    %12 = arith.addf %9, %11 : vector<3x128xf32>
    %cst_11 = arith.constant dense<0xFF800000> : vector<128xf32>
    %13 = vector.multi_reduction <maximumf>, %12, %cst_11 [0] : vector<3x128xf32> to vector<128xf32>
    %14 = vector.shape_cast %13 : vector<128xf32> to vector<1x128xf32>
    %15 = vector.broadcast %14 : vector<1x128xf32> to vector<3x128xf32>
    %16 = arith.subf %12, %15 : vector<3x128xf32>
    %17 = math.exp %16 : vector<3x128xf32>
    %cst_12 = arith.constant dense<0.000000e+00> : vector<128xf32>
    %18 = vector.multi_reduction <add>, %17, %cst_12 [0] : vector<3x128xf32> to vector<128xf32>
    %19 = vector.shape_cast %18 : vector<128xf32> to vector<1x128xf32>
    %20 = vector.broadcast %19 : vector<1x128xf32> to vector<3x128xf32>
    %21 = arith.divf %17, %20 : vector<3x128xf32>
    %c0_13 = arith.constant 0 : index
    %c0_14 = arith.constant 0 : index
    %22 = vector.load %arg6[%c0_13, %c0_14] : memref<3x128xf32, #tpu.memory_space<vmem>>, vector<3x128xf32>
    tpu.vector_store %arg6[%c0_13, %c0_14], %21 {strides = array<i32>} : memref<3x128xf32, #tpu.memory_space<vmem>>, vector<3x128xf32>,
    return
  }
  func.func @transform_0(%arg0: i32) -> (i32, i32) {
    %c0_i32 = arith.constant 0 : i32
    %c0_i32_0 = arith.constant 0 : i32
    return %c0_i32, %arg0 : i32, i32
  }
  func.func @transform_1(%arg0: i32) -> (i32, i32) {
    %c0_i32 = arith.constant 0 : i32
    %c0_i32_0 = arith.constant 0 : i32
    %c0_i32_1 = arith.constant 0 : i32
    return %c0_i32, %c0_i32_0 : i32, i32
  }
  func.func @transform_2(%arg0: i32) -> (i32, i32) {
    %c0_i32 = arith.constant 0 : i32
    %c0_i32_0 = arith.constant 0 : i32
    %c0_i32_1 = arith.constant 0 : i32
    return %c0_i32, %c0_i32_0 : i32, i32
  }
  func.func @transform_3(%arg0: i32) -> (i32, i32) {
    %c0_i32 = arith.constant 0 : i32
    %c0_i32_0 = arith.constant 0 : i32
    %c0_i32_1 = arith.constant 0 : i32
    return %c0_i32, %c0_i32_0 : i32, i32
  }
  func.func @transform_4(%arg0: i32) -> (i32, i32) {
    %c0_i32 = arith.constant 0 : i32
    %c0_i32_0 = arith.constant 0 : i32
    %c0_i32_1 = arith.constant 0 : i32
    return %c0_i32, %c0_i32_0 : i32, i32
  }
  func.func @transform_5(%arg0: i32) -> (i32, i32) {
    %c0_i32 = arith.constant 0 : i32
    %c0_i32_0 = arith.constant 0 : i32
    return %c0_i32, %arg0 : i32, i32
  }
}

</mosaic_0001>

<bundles_post_ra>
// kernel: bpnet_forward.2
= control target key start
LH: loop header
LB: loop body
LE: loop exit
PB: predicated region body
PF: predicated region fallthrough
CT: control target
= control target key end

     0   :  { %s406_s0 = inlined_call_operand.vmem [shape: f32[20,1], index: 0, kind: input, shape index: {}]   ;;  %s407_s1 = inlined_call_operand.vmem [shape: f32[3,1], index: 1, kind: input, shape index: {}]   ;;  %s408_s2 = inlined_call_operand.vmem [shape: f32[4,20], index: 2, kind: input, shape index: {}]   ;;  %s409_s3 = inlined_call_operand.vmem [shape: f32[20,3], index: 3, kind: input, shape index: {}]   ;;  %s410_s4 = inlined_call_operand.vmem [shape: f32[4,8], index: 4, kind: input, shape index: {}]   ;;  %s411_s5 = inlined_call_operand.<no memory space> [shape: f32[], index: 5, kind: input, shape index: {}]   ;;  %s412_s6 = inlined_call_operand.vmem [shape: f32[3,128], index: 6, kind: output, shape index: {}]  }
   0x1   :  { %v11_v0 = vstv %s411_s5 }
   0x2   :  { %v23_v1 = vlaneseq  ;;  %v35_v2 = vld [vmem:[%s408_s2] sm:$0xff]  ;;  %v328_v3 = vmov 0.0   ;;  %vm329_vm0 = vmmov 0   ;;  %v279_v4 = vld [vmem:[%s408_s2 + $0x8] sm:$0xff]  ;;  %v280_v5 = vld [vmem:[%s408_s2 + $0x10] sm:$0xff]  ;;  %v330_v10 = vmov 0  }
   0x3   :  { %295 = vmatprep.subr.mxu0 %v328_v3  ;;  %297 = vmatprep.mubr.msk.f32.mxu0 %vm329_vm0, %v328_v3  ;;  %v55_v6 = vld [vmem:[%s406_s0] sm:$0xff]  ;;  %47 = vst [vmem:[#allocation8 + $0x10] sm:$0xff] %v280_v5  ;;  %v57_v11 = vld [vmem:[%s406_s0 + $0x10] sm:$0xf]  ;;  %v56_v12 = vld [vmem:[%s406_s0 + $0x8] sm:$0xff]  ;;  %vm83_vm3 = vcmask 1043456  }
   0x4   :  { %v22_v7 = vld [vmem:[%s410_s4] sm:$0xf]  ;;  %v24_v8 = vshrl.u32 %v23_v1, 7  ;;  %v29_v9 = vand.u32 127, %v23_v1  ;;  %322 = vset.pattern.permute.xlu0 %v330_v10  ;;  %323 = vset.pattern.permute.xlu1 %v330_v10  ;;  %vm73_vm4 = vcmask 31744   ;;  %v331_v19 = vmov 0.0|0.0  }
   0x5   :  { %60 = vperm.xlu0 %322, %v55_v6   ;;  %70 = vperm.xlu1 %323, %v57_v11   ;;  %v171_v13 = vld [vmem:[%s407_s1] sm:$0x7]  ;;  %vm177_vm5 = vcmask 162816   ;;  %vm254_vm6 = vcmask 1042432  }
   0x6   :  { %vm26_vm1 = vcmp.lt.s32.totalorder %v24_v8, 4  ;;  %vm31_vm2 = vcmp.lt.s32.totalorder %v29_v9, 8  ;;  %312 = vmatprep.mubr.msk.f32.mxu1 %vm329_vm0, %v328_v3  ;;  %v48_v18 = vld [vmem:[%s409_s3] sm:$0x7]  ;;  %315 = vmatprep.subr.bf16.mxu1 %v331_v19 }
   0x7   :  { %v27_v14 = vsel %vm26_vm1, %v22_v7, %v11_v0  ;;  %50 = vst [vmem:[#allocation9] sm:$0xf] %v48_v18 }
   0x8   :  { %v32_v15 = vsel %vm31_vm2, %v27_v14, %v11_v0 }
   0x9   :  { %34 = vst [vmem:[#allocation7] sm:$0xf] %v32_v15  ;;  %65 = vperm.xlu0 %322, %v56_v12   ;;  %174 = vperm.xlu1 %323, %v171_v13  }
   0xa   :  { %v54_v17 = vld [vmem:[#allocation8 + $0x10] sm:$0xf] }
   0xe   :  { %v170_v36 = vld [vmem:[#allocation9] sm:$0x7] }
  0x10   :  { %v51_v16 = vld [vmem:[#allocation7] sm:$0xf] }
  0x11   :  { %296 = vmatpush3.msk.msra.mxu0 %vm83_vm3, %v51_v16 }
  0x12   :  { %298 = vmatmul.mubr.msk.f32.vlgmr.msra.gmra.mrb[0].mxu0 %vm73_vm4, %v35_v2 }
  0x13   :  { %300 = vmatprep.mubr.msk.f32.mxu0 %vm329_vm0, %v328_v3 }
  0x16   :  { %301 = vmatmul.mubr.msk.f32.gmra.mrb[2].mxu0 %vm73_vm4, %v279_v4 }
  0x17   :  { %303 = vmatprep.mubr.msk.f32.mxu0 %vm329_vm0, %v328_v3 }
  0x1a   :  { %304 = vmatmul.mubr.msk.f32.gmra.mrb[4].mxu0 %vm73_vm4, %v54_v17 }
  0x84   :  { %v61_v20 = vpop.permute.xlu0 %60  ;;  %v71_v30 = vpop.permute.xlu1 %70 }
  0x88   :  { %v66_v24 = vpop.permute.xlu0 %65  ;;  %v175_v37 = vpop.permute.xlu1 %174 }
  0xe5   :  { %v153_v21 = vpop.f32.mrb[0].mxu0 }
  0xe6   :  { %v299_v22 = vpop.f32.mrb[1].mxu0  ;;  %v154_v23 = vadd.f32 %v153_v21, %v61_v20 }
  0xe8   :  { %v167_v28 = vmax.f32 %v154_v23, 0.0 }
  0xe9   :  { %v158_v25 = vpop.f32.mrb[2].mxu0 }
  0xea   :  { %v159_v26 = vadd.f32 %v158_v25, %v66_v24  ;;  %v302_v27 = vpop.f32.mrb[3].mxu0 }
  0xec   :  { %v168_v29 = vmax.f32 %v159_v26, 0.0 }
  0xed   :  { %v163_v31 = vpop.f32.mrb[4].mxu0 }
  0xee   :  { %v164_v32 = vadd.f32 %v163_v31, %v71_v30  ;;  %v305_v33 = vpop.f32.mrb[5].mxu0  ;;  %v316_v34 = vpack.c.bf16 %v168_v29, %v167_v28 }
  0xf0   :  { %v169_v35 = vmax.f32 %v164_v32, 0.0  ;;  %317 = vmatpush3.bf16.msra.mxu1 %v316_v34 }
  0xf1   :  { %310 = vmatprep.subr.mxu1 %v328_v3 }
  0xf4   :  { %311 = vmatpush3.msk.msra.mxu1 %vm83_vm3, %v169_v35 }
  0xf5   :  { %313 = vmatmul.mubr.msk.f32.vlgmr.msra.gmra.mrb[0].mxu1 %vm177_vm5, %v170_v36 }
 0x1c8   :  { %v250_v38 = vpop.f32.mrb[0].mxu1 }
 0x1c9   :  { %v251_v39 = vadd.f32 %v250_v38, %v175_v37  ;;  %v314_v40 = vpop.f32.mrb[1].mxu1 }
 0x1cb   :  { %v255_v41 = vsel %vm254_vm6, %v251_v39, -inf }
 0x1cc   :  { %v256_v42 = vrot.slane %v255_v41, 4 }
 0x1ce   :  { %v257_v43 = vmax.f32 %v255_v41, %v256_v42 }
 0x1d0   :  { %v258_v44 = vrot.slane %v257_v43, 2 }
 0x1d2   :  { %v259_v45 = vmax.f32 %v257_v43, %v258_v44 }
 0x1d4   :  { %v260_v46 = vrot.slane %v259_v45, 1 }
 0x1d6   :  { %v261_v47 = vmax.f32 %v259_v45, %v260_v46 }
 0x1d8   :  { %v262_v48 = vsub.f32 %v251_v39, %v261_v47 }
 0x1da   :  { %v263_v49 = vmul.f32 1.442695, %v262_v48 }
 0x1dc   :  { %324 = vpow2.f32 %v263_v49 }
 0x1e6   :  { %v325_v50 = vpop.eup %324 }
 0x1e7   :  { %v265_v51 = vsel %vm254_vm6, %v325_v50, 0.0 }
 0x1e8   :  { %v266_v52 = vrot.slane %v265_v51, 4 }
 0x1ea   :  { %v267_v53 = vadd.f32 %v266_v52, %v265_v51 }
 0x1ec   :  { %v268_v54 = vrot.slane %v267_v53, 2 }
 0x1ee   :  { %v269_v55 = vadd.f32 %v268_v54, %v267_v53 }
 0x1f0   :  { %v270_v56 = vrot.slane %v269_v55, 1 }
 0x1f2   :  { %v271_v57 = vadd.f32 %v270_v56, %v269_v55 }
 0x1f4   :  { %326 = vrcp.f32 %v271_v57 }
 0x1fe   :  { %v327_v58 = vpop.eup %326 }
 0x1ff   :  { %v273_v59 = vmul.f32 %v327_v58, %v325_v50 }
 0x201   :  { %274 = vst [vmem:[%s412_s6] sm:$0x7] %v273_v59 }

</bundles_post_ra>
